<compile_context>
chip_gen: v7x
topology: tpu7x:2x2x1
jax: 0.10.0
libtpu: 0.0.40
codegen_flags: <defaults>
</compile_context>

<pallas_src>
import functools

import jax
import jax.numpy as jnp
from jax.experimental import pallas as pl
from jax.experimental.pallas import tpu as pltpu

LANES = 128
MIN_TILE_ELEMS = 8 * LANES   # 1024: one f32 vreg; wrapper pads only to this.
MAX_BLOCK_ROWS = 4096        # 4096*128*4B = 2 MiB per input per grid step (f32).
NUM_SPLITS = 2               # leading "parallel" axis (both TCs on v7x).


def _sse_kernel(y_ref, t_ref, acc_ref, *, block_rows, total_rows,
                blocks_per_split, need_mask):
    """Accumulate sum-of-squared-differences partials into the output block."""
    c = pl.program_id(0)   # parallel split index
    i = pl.program_id(1)   # sequential reduction axis (last in grid)

    @pl.when(i == 0)
    def _():
        acc_ref[...] = jnp.zeros_like(acc_ref)

    d = t_ref[...].astype(jnp.float32) - y_ref[...].astype(jnp.float32)
    sq = d * d

    if need_mask:
        # Logical (unclamped) block index; rows beyond the real array (edge
        # padding / overflow re-read of a clamped block) contribute zero.
        blk = c * blocks_per_split + i
        row0 = blk * block_rows
        row_ids = row0 + jax.lax.broadcasted_iota(
            jnp.int32, (block_rows, LANES), 0)
        sq = jnp.where(row_ids < total_rows, sq, 0.0)

    # Reduce only across the vreg-index (major) axis: pure VPU vreg adds.
    # The expensive cross-lane/sublane reduce happens once, in the wrapper.
    partial = jnp.sum(sq.reshape(block_rows // 8, 8, LANES), axis=0)
    acc_ref[...] += partial.reshape(1, 8, LANES)


def rmse(y: jax.Array, t: jax.Array) -> jax.Array:
    """Root mean squared error, computed in a Pallas TPU kernel."""
    assert y.shape == t.shape, "y and t must have the same shape"
    n_true = int(y.size)

    flat_y = jnp.ravel(y)
    flat_t = jnp.ravel(t)
    pad = (-n_true) % MIN_TILE_ELEMS
    if pad:
        # Rare ragged case only (size not a multiple of 1024); zeros add 0 to
        # the squared-difference sum.  Common path has no HBM copy at all.
        flat_y = jnp.pad(flat_y, (0, pad))
        flat_t = jnp.pad(flat_t, (0, pad))

    rows = flat_y.size // LANES          # multiple of 8
    y2d = flat_y.reshape(rows, LANES)    # free reshape of contiguous data
    t2d = flat_t.reshape(rows, LANES)

    block_rows = min(MAX_BLOCK_ROWS, rows)
    num_blocks = pl.cdiv(rows, block_rows)
    bpc = pl.cdiv(num_blocks, NUM_SPLITS)          # blocks per parallel split
    covered_rows = NUM_SPLITS * bpc * block_rows
    need_mask = covered_rows != rows
    need_clamp = NUM_SPLITS * bpc > num_blocks

    if need_clamp:
        # Keep the DMA in-bounds for the overflow step(s); those steps are
        # fully masked to zero inside the kernel.
        def in_map(c, i):
            return (jnp.minimum(c * bpc + i, num_blocks - 1), 0)
    else:
        def in_map(c, i):
            return (c * bpc + i, 0)

    in_spec = pl.BlockSpec((block_rows, LANES), in_map)
    out_spec = pl.BlockSpec((1, 8, LANES), lambda c, i: (c, 0, 0))

    partials = pl.pallas_call(
        functools.partial(
            _sse_kernel,
            block_rows=block_rows,
            total_rows=rows,
            blocks_per_split=bpc,
            need_mask=need_mask,
        ),
        out_shape=jax.ShapeDtypeStruct((NUM_SPLITS, 8, LANES), jnp.float32),
        grid_spec=pltpu.PrefetchScalarGridSpec(
            num_scalar_prefetch=0,
            grid=(NUM_SPLITS, bpc),
            in_specs=[in_spec, in_spec],
            out_specs=out_spec,
        ),
        compiler_params=pltpu.CompilerParams(
            dimension_semantics=("parallel", "arbitrary"),
        ),
    )(y2d, t2d)

    # Single cross-lane reduce + divide + sqrt on a tiny (2, 8, 128) array.
    sse = jnp.sum(partials)
    return jnp.sqrt(sse / jnp.float32(n_true))


if __name__ == "__main__":
    key = jax.random.PRNGKey(0)
    ky, kt = jax.random.split(key)
    shape = (2, 4, 16, 16)  # NCHW-like small example
    y = jax.random.normal(ky, shape, dtype=jnp.float32)
    t = jax.random.normal(kt, shape, dtype=jnp.float32)

    result = jax.block_until_ready(rmse(y, t))

    # Sanity check against plain-JAX reference.
    ref = jnp.sqrt(jnp.mean((t - y) ** 2))
    assert jnp.allclose(result, ref, rtol=1e-5, atol=1e-6), (result, ref)

    print("KERNEL_OK")
</pallas_src>

<mosaic_0001>
module attributes {stable_mosaic.version = 11 : i64} {
  func.func @_sse_kernel(%arg0: i32, %arg1: i32, %arg2: memref<16x128xf32, #tpu.memory_space<vmem>>, %arg3: memref<16x128xf32, #tpu.memory_space<vmem>>, %arg4: memref<1x8x128xf32, #tpu.memory_space<vmem>>) attributes {dimension_semantics = [#tpu.dimension_semantics<parallel>, #tpu.dimension_semantics<arbitrary>], iteration_bounds = array<i64: 2, 1>, scalar_prefetch = 0 : i64, scratch_operands = 0 : i64, tpu.core_type = #tpu.core_type<tc>, window_params = [{transform_indices = @transform_0, window_bounds = array<i64: 16, 128>}, {transform_indices = @transform_1, window_bounds = array<i64: 16, 128>}, {transform_indices = @transform_2, window_bounds = array<i64: 1, 8, 128>}]} {
    %c0_i32 = arith.constant 0 : i32
    %0 = arith.cmpi eq, %arg1, %c0_i32 : i32
    %1 = arith.extui %0 : i1 to i32
    %c0_i32_0 = arith.constant 0 : i32
    %2 = arith.cmpi ne, %1, %c0_i32_0 : i32
    scf.if %2 {
      %cst_12 = arith.constant 0.000000e+00 : f32
      %23 = vector.broadcast %cst_12 : f32 to vector<1x8x128xf32>
      %c0_13 = arith.constant 0 : index
      %c0_14 = arith.constant 0 : index
      %c0_15 = arith.constant 0 : index
      %24 = vector.load %arg4[%c0_13, %c0_14, %c0_15] : memref<1x8x128xf32, #tpu.memory_space<vmem>>, vector<1x8x128xf32>
      tpu.vector_store %arg4[%c0_13, %c0_14, %c0_15], %23 {strides = array<i32>} : memref<1x8x128xf32, #tpu.memory_space<vmem>>, vector<1x8x128xf32>,
    } else {
    }
    %c0 = arith.constant 0 : index
    %c0_1 = arith.constant 0 : index
    %3 = vector.load %arg3[%c0, %c0_1] : memref<16x128xf32, #tpu.memory_space<vmem>>, vector<16x128xf32>
    %c0_2 = arith.constant 0 : index
    %c0_3 = arith.constant 0 : index
    %4 = vector.load %arg2[%c0_2, %c0_3] : memref<16x128xf32, #tpu.memory_space<vmem>>, vector<16x128xf32>
    %5 = arith.subf %3, %4 : vector<16x128xf32>
    %6 = arith.mulf %5, %5 : vector<16x128xf32>
    %c1_i32 = arith.constant 1 : i32
    %7 = arith.muli %arg0, %c1_i32 : i32
    %8 = arith.addi %7, %arg1 : i32
    %c16_i32 = arith.constant 16 : i32
    %9 = arith.muli %8, %c16_i32 : i32
    %10 = tpu.iota {dimensions = array<i32: 0>} : vector<16x128xi32>
    %11 = vector.broadcast %9 : i32 to vector<16x128xi32>
    %12 = arith.addi %11, %10 : vector<16x128xi32>
    %c16_i32_4 = arith.constant 16 : i32
    %13 = vector.broadcast %c16_i32_4 : i32 to vector<16x128xi32>
    %14 = arith.cmpi slt, %12, %13 : vector<16x128xi32>
    %cst = arith.constant 0.000000e+00 : f32
    %15 = vector.broadcast %cst : f32 to vector<16x128xf32>
    %16 = arith.select %14, %6, %15 : vector<16x128xi1>, vector<16x128xf32>
    %17 = vector.shape_cast %16 : vector<16x128xf32> to vector<2x8x128xf32>
    %cst_5 = arith.constant dense<0.000000e+00> : vector<8x128xf32>
    %18 = vector.multi_reduction <add>, %17, %cst_5 [0] : vector<2x8x128xf32> to vector<8x128xf32>
    %c0_6 = arith.constant 0 : index
    %c0_7 = arith.constant 0 : index
    %c0_8 = arith.constant 0 : index
    %19 = vector.load %arg4[%c0_6, %c0_7, %c0_8] : memref<1x8x128xf32, #tpu.memory_space<vmem>>, vector<1x8x128xf32>
    %20 = vector.shape_cast %18 : vector<8x128xf32> to vector<1x8x128xf32>
    %21 = arith.addf %19, %20 : vector<1x8x128xf32>
    %c0_9 = arith.constant 0 : index
    %c0_10 = arith.constant 0 : index
    %c0_11 = arith.constant 0 : index
    %22 = vector.load %arg4[%c0_9, %c0_10, %c0_11] : memref<1x8x128xf32, #tpu.memory_space<vmem>>, vector<1x8x128xf32>
    tpu.vector_store %arg4[%c0_9, %c0_10, %c0_11], %21 {strides = array<i32>} : memref<1x8x128xf32, #tpu.memory_space<vmem>>, vector<1x8x128xf32>,
    return
  }
  func.func @transform_0(%arg0: i32, %arg1: i32) -> (i32, i32) {
    %c1_i32 = arith.constant 1 : i32
    %0 = arith.muli %arg0, %c1_i32 : i32
    %1 = arith.addi %0, %arg1 : i32
    %c0_i32 = arith.constant 0 : i32
    %2 = arith.minsi %1, %c0_i32 : i32
    %c0_i32_0 = arith.constant 0 : i32
    %c0_i32_1 = arith.constant 0 : i32
    return %2, %c0_i32_0 : i32, i32
  }
  func.func @transform_1(%arg0: i32, %arg1: i32) -> (i32, i32) {
    %c1_i32 = arith.constant 1 : i32
    %0 = arith.muli %arg0, %c1_i32 : i32
    %1 = arith.addi %0, %arg1 : i32
    %c0_i32 = arith.constant 0 : i32
    %2 = arith.minsi %1, %c0_i32 : i32
    %c0_i32_0 = arith.constant 0 : i32
    %c0_i32_1 = arith.constant 0 : i32
    return %2, %c0_i32_0 : i32, i32
  }
  func.func @transform_2(%arg0: i32, %arg1: i32) -> (i32, i32, i32) {
    %c0_i32 = arith.constant 0 : i32
    %c0_i32_0 = arith.constant 0 : i32
    %c0_i32_1 = arith.constant 0 : i32
    return %arg0, %c0_i32, %c0_i32_0 : i32, i32, i32
  }
}

</mosaic_0001>

<bundles_post_ra>
// kernel: tpu_custom_call.1
= control target key start
LH: loop header
LB: loop body
LE: loop exit
PB: predicated region body
PF: predicated region fallthrough
CT: control target
= control target key end

     0   :  { %7 = vsyncpa [#allocation3], 0  ;;  %s892_s0 = inlined_call_operand.hbm [shape: f32[16,128], index: 0, kind: input, shape index: {}]   ;;  %s893_s1 = inlined_call_operand.hbm [shape: f32[16,128], index: 1, kind: input, shape index: {}]   ;;  %s894_s2 = inlined_call_operand.hbm [shape: f32[2,8,128], index: 2, kind: output, shape index: {}]  }
   0x1   :  { %9 = vsyncpa [#allocation3 + $0x1], 0 }
   0x2   :  { %10 = vsyncpa [#allocation6], 0 }
   0x3   :  { %12 = vsyncpa [#allocation6 + $0x1], 0 }
   0x4   :  { %13 = vsyncpa [#allocation4], 0 }
   0x5   :  { %15 = vsyncpa [#allocation4 + $0x1], 0  ;;  %s688_s9 = smov 0   ;;  %s690_s10 = smov 0  }
   0x6   :  { %s692_s11 = smov 0   ;;  %s694_s12 = smov 0  }
   0x7   :  { %s696_s13 = smov 0   ;;  %s698_s14 = smov 0  }
   0x8   :  { %s700_s15 = smov 0   ;;  %s702_s16 = smov 0  }
   0x9 LB: > { %s384_s17 = sadd.s32 4294967295, %s666_s16   ;;  %s385_s18 = sadd.s32 4294967294, %s666_s16   ;;  %s666_s16 = sphi %s702_s16, %s21_s16   ;;  %s662_s15 = sphi %s700_s15, %s913_s15   ;;  %s658_s14 = sphi %s698_s14, %s912_s14   ;;  %s654_s13 = sphi %s696_s13, %s882_s13   ;;  %s650_s12 = sphi %s694_s12, %s911_s12   ;;  %s646_s11 = sphi %s692_s11, %s910_s11   ;;  %s642_s10 = sphi %s690_s10, %s909_s10   ;;  %s638_s9 = sphi %s688_s9, %s908_s9  }
   0xa   : > { %s33_s19 = sadd.s32 1, %s662_s15  ;;  %p635_p1 = scmp.ne.s32.totalorder %s654_s13, 0 }
   0xb   : > { %p35_p0 = scmp.ge.s32.totalorder %s33_s19, 2  ;;  %p54_p2 = scmp.eq.s32.totalorder %s666_s16, 0 }
   0xc   : > { %p59_p3 = scmp.ne.s32.totalorder %s654_s13, %s650_s12  ;;  %p60_p5 = scmp.eq.s32.totalorder %s384_s17, 0 }
   0xd   : > { %s915_s19 = smov (%p35_p0, %s33_s19), 0  ;;  %p734_p4 = por %p635_p1, %p54_p2 }
   0xe   : > { %p738_p6 = por %p60_p5, %p59_p3  ;;  %s101_s22 = ssub.s32 %s662_s15, %s915_s19 }
   0xf   : > { %p102_p7 = scmp.eq.s32.totalorder %s101_s22, 0  ;;  %s104_s23 = sadd.s32 1, %s646_s11 }
  0x10   : > { %s898_s21 = scalar_select %p738_p6, 1, 0 }
  0x11   : > { %s746_s24 = scalar_select %p102_p7, %s646_s11, %s104_s23  }
  0x12   : > { %p114_p8 = scmp.ne.s32.totalorder %s646_s11, %s642_s10  ;;  %p115_p9 = scmp.eq.s32.totalorder %s384_s17, 1 }
  0x13   : > { %p120_p10 = scmp.ne.s32.totalorder %s642_s10, %s638_s9  ;;  %p121_p11 = scmp.eq.s32.totalorder %s385_s18, 1 }
  0x14   : > { %p752_p12 = por %p115_p9, %p114_p8  ;;  %p422_p1 = scmp.lt.s32.totalorder %s666_s16, 2 }
  0x15   : > { %p757_p0 = por %p121_p11, %p120_p10  ;;  %s668_s27 = smov [#allocation2]  }
  0x16   : > { %s899_s25 = scalar_select %p752_p12, 1, 0 }
  0x17   : > { %s900_s26 = scalar_select %p757_p0, 1, 0 }
  0x18   : > { %s155_s28 = sshll.u32 %s668_s27, 4  ;;  %p764_p2 = pnand %p422_p1, %p734_p4  ;;  %s156_s28 = int_to_ptr.vmem [resolvable:$true] %s155_s28 }
  0x19   : > { %s499_s4 = scalar_lea.hbm %s892_s0, 256 }
  0x1a   : > { %p500_p3 = scmp.ne.s32.totalorder %s892_s0, %s499_s4  ;;  %p501_p5 = pneg %p764_p2 }
  0x1b   : > { %p506_p8 = scmp.lt.u32.totalorder %s499_s4, %s499_s4  ;;  %p508_p9 = scmp.lt.u32.totalorder %s499_s4, %s892_s0 }
  0x1c   : > { %p502_p7 = pnand %p501_p5, %p500_p3 }
  0x1d   : > { %p509_p10 = por %p508_p9, %p506_p8 }
  0x1e   : > { %p503_p4 = pneg %p502_p7 }
  0x20   : > { %p510_p11 = pnand %p509_p10, %p503_p4 }
  0x22   : > { %513 = shalt.err (!%p510_p11)
}
  0x23   : > { %s514_s12 = scalar_lea.vmem %s156_s28, 256  ;;  %s521_s17 = scalar_lea.vmem %s156_s28, 512 }
  0x24   : > { %p515_p1 = scmp.ne.s32.totalorder %s156_s28, %s514_s12  ;;  %p522_p12 = scmp.lt.s32.totalorder %s156_s28, %s156_s28 }
  0x25   : > { %p523_p6 = scmp.lt.s32.totalorder %s521_s17, %s514_s12 }
  0x26   : > { %p517_p13 = pnand %p515_p1, %p501_p5 }
  0x27   : > { %p524_p3 = por %p523_p6, %p522_p12 }
  0x28   : > { %p518_p0 = pneg %p517_p13 }
  0x2a   : > { %p525_p7 = pnand %p524_p3, %p518_p0 }
  0x2c   : > { %528 = shalt.err (!%p525_p7)
}
  0x2d   : > { %s669_s18 = smov 128   ;;  %s670_s20 = smov 8  }
  0x2e   : > { %414 = dma.hbm_to_vmem [thread:$0]  (!%p764_p2), %s892_s0, 256, %s156_s28, [#allocation3], %s669_s18, %s669_s18, %s670_s20  }
  0x2f   : > { %p394_p13 = scmp.ge.s32.totalorder %s666_s16, 1  ;;  %p187_p4 = scmp.lt.s32.totalorder %s666_s16, 3 }
  0x30   : > { %s671_s30 = smov [#allocation5]   ;;  %s529_s6 = scalar_lea.hbm %s893_s1, 256 }
  0x31   : > { %p795_p8 = pnand %p394_p13, %p187_p4  ;;  %s179_s3 = sshll.u32 %s671_s30, 4  ;;  %s180_s3 = int_to_ptr.vmem [resolvable:$true] %s179_s3 }
  0x32   : > { %p530_p6 = scmp.ne.s32.totalorder %s893_s1, %s529_s6  ;;  %p536_p9 = scmp.lt.u32.totalorder %s529_s6, %s529_s6 }
  0x33   : > { %s902_s27 = scalar_select %p795_p8, 1, 0 }
  0x34   : > { %p532_p12 = pnand %p530_p6, %p501_p5  ;;  %p538_p10 = scmp.lt.u32.totalorder %s529_s6, %s893_s1 }
  0x36   : > { %p533_p0 = pneg %p532_p12  ;;  %p539_p11 = por %p538_p10, %p536_p9 }
  0x38   : > { %p540_p1 = pnand %p539_p11, %p533_p0 }
  0x3a   : > { %543 = shalt.err (!%p540_p1)
}
  0x3b   : > { %s544_s17 = scalar_lea.vmem %s180_s3, 256  ;;  %s551_s22 = scalar_lea.vmem %s180_s3, 512 }
  0x3c   : > { %p545_p3 = scmp.ne.s32.totalorder %s180_s3, %s544_s17  ;;  %p552_p4 = scmp.lt.s32.totalorder %s180_s3, %s180_s3 }
  0x3d   : > { %p553_p8 = scmp.lt.s32.totalorder %s551_s22, %s544_s17 }
  0x3e   : > { %p547_p7 = pnand %p545_p3, %p501_p5 }
  0x3f   : > { %p554_p6 = por %p553_p8, %p552_p4 }
  0x40   : > { %p548_p13 = pneg %p547_p7 }
  0x42   : > { %p555_p12 = pnand %p554_p6, %p548_p13 }
  0x44   : > { %558 = shalt.err (!%p555_p12)
}
  0x45   : > { %417 = dma.hbm_to_vmem [thread:$0]  (!%p764_p2), %s893_s1, 256, %s180_s3, [#allocation6], %s669_s18, %s669_s18, %s670_s20  }
  0x46   : > { %p903_p0 = scmp.ne.s32.totalorder %s902_s27, 0 }
  0x47   : > { %s193_s4 = sand.u32 (!%p903_p0), 1, %s654_s13   ;;  %p904_p5 = scmp.ne.s32.totalorder (!%p903_p0), %s898_s21, 0 }
  0x48   : > { %191 = sbr.rel (%p903_p0) target bundleno = 109 (0x6d), region = 28  ;;  %s395_s5 = sshll.u32 (!%p903_p0), %s193_s4, 4 }
  0x49   : > { %s194_s6 = scalar_lea.sflag (!%p903_p0), [#allocation3], %s193_s4  ;;  %s197_s7 = scalar_lea.vmem (!%p903_p0), [#allocation2], %s395_s5 }
  0x4f   : > { %624 = dma.done.wait (%p904_p5), %s194_s6, 256  }
  0x50   : > { %626 = vsyncadd (%p904_p5), %s194_s6, 4294967040  ;;  %s203_s29 = scalar_lea.sflag [#allocation6], %s193_s4  ;;  %s206_s8 = scalar_lea.vmem [#allocation5], %s395_s5 }
  0x51   : > { %628 = dma.done.wait (%p904_p5), %s203_s29, 256  }
  0x52   : > { %630 = vsyncadd (%p904_p5), %s203_s29, 4294967040  ;;  %s398_s18 = sshll.u32 %s658_s14, 4  ;;  %v255_v0 = vlaneseq  ;;  %s229_s20 = sand.u32 1, %s642_s10   ;;  %v245_v6 = vld [vmem:[%s206_s8] sm:$0xff]  ;;  %v246_v7 = vld [vmem:[%s206_s8 + $0x8] sm:$0xff] }
  0x53   : > { %v258_v2 = vstv %s398_s18  ;;  %s397_s27 = sshll.u32 %s229_s20, 3  ;;  %v247_v8 = vld [vmem:[%s197_s7] sm:$0xff]  ;;  %v248_v9 = vld [vmem:[%s197_s7 + $0x8] sm:$0xff]  ;;  %s400_s21 = sshll.u32 %s658_s14, 7 }
  0x54   : > { %v256_v1 = vshrl.u32 %v255_v0, 7  ;;  %v249_v10 = vsub.f32 %v245_v6, %v247_v8  ;;  %v250_v11 = vsub.f32 %v246_v7, %v248_v9  ;;  %s231_s3 = scalar_lea.vmem [#allocation7], %s397_s27  ;;  %s839_s22 = scalar_lea.hbm %s894_s2, %s400_s21 }
  0x55   : > { %s283_s28 = sshll.u32 %s231_s3, 4  ;;  %s270_s23 = scalar_lea.sflag [#allocation4], %s229_s20  ;;  %s841_s28 = int_to_ptr.vmem [resolvable:$true] %s283_s28 }
  0x56   : > { %v257_v3 = vadd.s32 8, %v256_v1  ;;  %v259_v4 = vadd.s32 %v258_v2, %v256_v1  ;;  %v251_v12 = vmul.f32 %v249_v10, %v249_v10  ;;  %v252_v13 = vmul.f32 %v250_v11, %v250_v11  ;;  %s559_s30 = scalar_lea.vmem %s841_s28, 128  ;;  %p905_p8 = scmp.ne.s32.totalorder %s899_s25, 0 }
  0x57   : > { %p560_p2 = scmp.ne.s32.totalorder %s841_s28, %s559_s30  ;;  %s672_s14 = smov [#allocation7]  }
  0x58   : > { %v260_v5 = vadd.s32 %v258_v2, %v257_v3  ;;  %vm261_vm0 = vcmp.lt.s32.totalorder %v259_v4, 16  ;;  %s563_s4 = sshll.u32 %s672_s14, 4  ;;  %s564_s4 = int_to_ptr.vmem [resolvable:$false] %s563_s4 }
  0x59   : > { %v263_v14 = vsel %vm261_vm0, %v251_v12, 0.0  ;;  %p561_p9 = pnand %p560_p2, %p905_p8  ;;  %s565_s5 = scalar_lea.vmem %s564_s4, 256 }
  0x5a   : > { %vm262_vm1 = vcmp.lt.s32.totalorder %v260_v5, 16  ;;  %p566_p11 = scmp.lt.s32.totalorder %s841_s28, %s564_s4  ;;  %p567_p1 = scmp.lt.s32.totalorder %s565_s5, %s559_s30 }
  0x5b   : > { %v264_v15 = vsel %vm262_vm1, %v252_v13, 0.0  ;;  %p562_p10 = pneg %p561_p9 }
  0x5c   : > { %v265_v16 = vadd.f32 %v264_v15, %v263_v14  ;;  %p568_p3 = por %p567_p1, %p566_p11 }
  0x5e   : > { %268 = vst [vmem:[%s231_s3] sm:$0xff] %v265_v16  ;;  %p569_p7 = pnand %p568_p3, %p562_p10 }
  0x60   : > { %572 = shalt.err (!%p569_p7)
}
  0x61   : > { %s573_s6 = scalar_lea.hbm %s839_s22, 128  ;;  %s577_s8 = scalar_lea.hbm %s894_s2, 256 }
  0x62   : > { %p574_p13 = scmp.ne.s32.totalorder %s839_s22, %s573_s6  ;;  %p578_p12 = scmp.lt.u32.totalorder %s839_s22, %s894_s2 }
  0x63   : > { %p579_p0 = scmp.lt.u32.totalorder %s577_s8, %s573_s6  ;;  %p581_p2 = scmp.lt.u32.totalorder %s573_s6, %s839_s22 }
  0x64   : > { %p575_p4 = pnand %p574_p13, %p905_p8 }
  0x65   : > { %p580_p5 = por %p579_p0, %p578_p12 }
  0x66   : > { %p576_p6 = pneg %p575_p4 }
  0x67   : > { %p582_p9 = por %p581_p2, %p580_p5 }
  0x69   : > { %p583_p10 = pnand %p582_p9, %p576_p6 }
  0x6b   : > { %586 = shalt.err (!%p583_p10)
}
  0x6c   : > { %409 = dma.vmem_to_hbm [thread:$0]  (%p905_p8), %s841_s28, 128, %s839_s22, %s270_s23  }
  0x6d PF: > { %s295_s27 = sand.u32 1, %s638_s9   ;;  %p906_p11 = scmp.ne.s32.totalorder %s900_s26, 0 }
  0x6e   : > { %p907_p1 = scmp.ge.s32.totalorder %s666_s16, 2  ;;  %s296_s21 = scalar_lea.sflag [#allocation4], %s295_s27 }
  0x70   : > { %p419_p3 = pnand %p907_p1, %p906_p11 }
  0x72   : > { %632 = dma.done.wait (!%p419_p3), %s296_s21, 128  }
  0x73   : > { %634 = vsyncadd (!%p419_p3), %s296_s21, 4294967168  ;;  %s21_s16 = sadd.s32 1, %s666_s16   ;;  %s908_s9 = smov %s642_s10 }
  0x74   : > { %p18_p7 = scmp.ge.s32.totalorder %s21_s16, 4   ;;  %s909_s10 = smov %s646_s11 }
  0x75   : > { %s910_s11 = smov %s746_s24  ;;  %s911_s12 = smov %s654_s13 }
  0x76   : > { %s882_s13 = smov 0   ;;  %s912_s14 = smov %s662_s15 }
  0x77   : > { %s913_s15 = smov %s915_s19  ;;  %20 = sbr.rel (!%p18_p7) target bundleno = 9 (0x9), region = 90 }
  0x7e   :  { %301 = vsyncpa [#allocation3], 1 }
  0x7f   :  { %303 = vsyncpa [#allocation3 + $0x1], 1 }
  0x80   :  { %304 = vsyncpa [#allocation6], 1 }
  0x81   :  { %306 = vsyncpa [#allocation6 + $0x1], 1 }
  0x82   :  { %307 = vsyncpa [#allocation4], 1 }
  0x83   :  { %309 = vsyncpa [#allocation4 + $0x1], 1 }

</bundles_post_ra>
